<compile_context>
chip_gen: v5e
topology: v5e:2x2
jax: 0.10.0
libtpu: 0.0.40
codegen_flags: <defaults>
</compile_context>

<pallas_src>
import functools
import math

import jax
import jax.numpy as jnp
from jax.experimental import pallas as pl
from jax.experimental.pallas import tpu as pltpu


def _round_up(x: int, m: int) -> int:
    return (x + m - 1) // m * m


def _vmem_capacity_bytes():
    try:
        return int(pltpu.get_tpu_info().vmem_capacity_bytes)
    except Exception:  # pragma: no cover - fall back if query unavailable
        return None


# ----------------------------------------------------------------------------
# One-time parameter preparation (load time, NOT per forward call).
# ----------------------------------------------------------------------------
def prepare_mlm_head_params(dense_w, dense_b, ln_gamma, ln_beta,
                            decoder_w, decoder_b, *, vocab_tile=1024,
                            param_dtype=None):
    """Transpose weights, pad the vocab axis to the tile, optionally cast to bf16.

    dense_w:   (H, H)  PyTorch layout (out, in)
    decoder_w: (V, H)  PyTorch layout (out, in)
    Returns a dict consumed by `yoso_mlm_head`.
    """
    H = dense_w.shape[0]
    V = decoder_w.shape[0]
    if param_dtype is not None:
        dense_w = dense_w.astype(param_dtype)
        decoder_w = decoder_w.astype(param_dtype)

    w1_t = dense_w.T                      # (H_in, H_out)
    wd_t = decoder_w.T                    # (H, V)

    tv = min(int(vocab_tile), _round_up(V, 128))
    tv = _round_up(tv, 128)
    v_p = _round_up(V, tv)
    if v_p != V:
        wd_t = jnp.pad(wd_t, ((0, 0), (0, v_p - V)))
        decoder_b = jnp.pad(decoder_b, (0, v_p - V))

    return dict(
        w1_t=w1_t,
        b1=dense_b.reshape(1, H),
        ln_gamma=ln_gamma.reshape(1, H),
        ln_beta=ln_beta.reshape(1, H),
        wd_t=wd_t,
        dec_bias=decoder_b.reshape(1, v_p),
        vocab_size=V,
        vocab_tile=tv,
    )


# ----------------------------------------------------------------------------
# Kernel body.
# ----------------------------------------------------------------------------
def _mlm_head_kernel(x_ref, w1_ref, b1_ref, g_ref, be_ref, wd_ref, bd_ref,
                     o_ref, t_scr, *, eps, precision):
    # x_ref:  (tm, H)  input rows (native dtype)
    # w1_ref: (H, H)   transform weight, pre-transposed, resident (Buffered(1))
    # b1/g/be: (1, H)  transform bias / LN gamma / LN beta (Buffered(1))
    # wd_ref: (H, tv)  decoder weight tile (streamed)
    # bd_ref: (1, tv)  decoder bias tile
    # o_ref:  (tm, tv) output logits tile
    # t_scr:  (tm, H)  scratch holding the transformed rows (decoder dtype)

    @pl.when(pl.program_id(1) == 0)
    def _compute_transform():
        h = jnp.dot(x_ref[...], w1_ref[...],
                    preferred_element_type=jnp.float32, precision=precision)
        h = h + b1_ref[...].astype(jnp.float32)
        # Exact (erf) GELU, matching HF ACT2FN["gelu"].
        h = 0.5 * h * (1.0 + jax.lax.erf(h * (1.0 / math.sqrt(2.0))))
        # LayerNorm over the hidden axis (f32 epilogue, stays in registers).
        mean = jnp.mean(h, axis=-1, keepdims=True)
        centered = h - mean
        var = jnp.mean(centered * centered, axis=-1, keepdims=True)
        normed = centered * jax.lax.rsqrt(var + eps)
        t = normed * g_ref[...].astype(jnp.float32) + be_ref[...].astype(jnp.float32)
        # Single cast to the decoder dtype; reused for every vocab tile.
        t_scr[...] = t.astype(t_scr.dtype)

    dec = jnp.dot(t_scr[...], wd_ref[...],
                  preferred_element_type=jnp.float32, precision=precision)
    o_ref[...] = (dec + bd_ref[...].astype(jnp.float32)).astype(o_ref.dtype)


# ----------------------------------------------------------------------------
# Forward wrapper (hot path: no weight padding / transposes in here).
# ----------------------------------------------------------------------------
def yoso_mlm_head(sequence_output, params, *, eps=1e-12, row_tile=None,
                  out_dtype=None, precision=None):
    """Fused YosoOnlyMLMHead forward.

    sequence_output: (B, S, H)
    params: output of `prepare_mlm_head_params`.
    """
    B, S, H = sequence_output.shape
    w1_t = params["w1_t"]
    b1_2 = params["b1"]
    g_2 = params["ln_gamma"]
    be_2 = params["ln_beta"]
    wd_t = params["wd_t"]
    bd_2 = params["dec_bias"]
    V = params["vocab_size"]
    tv = params["vocab_tile"]
    v_p = wd_t.shape[1]

    n_rows = B * S
    x2d = sequence_output.reshape(n_rows, H)
    out_dtype = out_dtype if out_dtype is not None else sequence_output.dtype

    # Dtype-aware sublane multiple: 8 (f32), 16 (bf16), 32 (int8/fp8).
    itemsize = jnp.dtype(sequence_output.dtype).itemsize
    sub = max(8, 32 // max(itemsize, 1))

    # Row tile sized from the VMEM roofline; only activation rows are padded
    # (cheap), never weights.
    vmem_cap = _vmem_capacity_bytes()
    if row_tile is None:
        row_tile = 768 if (vmem_cap or 0) >= (96 << 20) else 512
    tm = _round_up(min(int(row_tile), _round_up(n_rows, sub)), sub)
    rows_p = _round_up(n_rows, tm)
    if rows_p != n_rows:
        x2d = jnp.pad(x2d, ((0, rows_p - n_rows), (0, 0)))

    grid = (rows_p // tm, v_p // tv)

    # Transform result lives in the decoder-weight dtype (bf16 scratch if the
    # decoder is bf16) so the per-vocab-tile cast disappears.
    t_dtype = jnp.float32 if wd_t.dtype == jnp.float32 else wd_t.dtype

    vmem_limit = int(vmem_cap * 0.8) if vmem_cap else None

    w_isz = jnp.dtype(wd_t.dtype).itemsize
    cost = pl.CostEstimate(
        flops=2 * rows_p * H * (H + v_p),
        transcendentals=rows_p * H,
        bytes_accessed=(rows_p * H * itemsize                     # activations
                        + H * H * jnp.dtype(w1_t.dtype).itemsize  # transform W
                        + (rows_p // tm) * H * v_p * w_isz        # streamed dec W
                        + rows_p * v_p * jnp.dtype(out_dtype).itemsize),
    )

    resident = pl.Buffered(1)  # grid-invariant operands: no double-buffering

    out2d = pl.pallas_call(
        functools.partial(_mlm_head_kernel, eps=eps, precision=precision),
        out_shape=jax.ShapeDtypeStruct((rows_p, v_p), out_dtype),
        grid_spec=pltpu.PrefetchScalarGridSpec(
            num_scalar_prefetch=0,
            grid=grid,
            in_specs=[
                pl.BlockSpec((tm, H), lambda i, j: (i, 0)),                         # x rows
                pl.BlockSpec((H, H), lambda i, j: (0, 0), pipeline_mode=resident),  # transform W
                pl.BlockSpec((1, H), lambda i, j: (0, 0), pipeline_mode=resident),  # transform bias
                pl.BlockSpec((1, H), lambda i, j: (0, 0), pipeline_mode=resident),  # LN gamma
                pl.BlockSpec((1, H), lambda i, j: (0, 0), pipeline_mode=resident),  # LN beta
                pl.BlockSpec((H, tv), lambda i, j: (0, j)),                         # decoder W tile
                pl.BlockSpec((1, tv), lambda i, j: (0, j)),                         # decoder bias tile
            ],
            out_specs=pl.BlockSpec((tm, tv), lambda i, j: (i, j)),
            scratch_shapes=[pltpu.VMEM((tm, H), t_dtype)],
        ),
        compiler_params=pltpu.CompilerParams(
            dimension_semantics=("parallel", "arbitrary"),
            vmem_limit_bytes=vmem_limit,
        ),
        cost_estimate=cost,
    )(x2d, w1_t, b1_2, g_2, be_2, wd_t, bd_2)

    return out2d[:n_rows, :V].reshape(B, S, V)


# ----------------------------------------------------------------------------
# Pure-JAX reference (PyTorch semantics).
# ----------------------------------------------------------------------------
def _reference(sequence_output, dense_w, dense_b, ln_gamma, ln_beta,
               decoder_w, decoder_b, eps=1e-12):
    hi = jax.lax.Precision.HIGHEST
    h = jnp.einsum("bsh,oh->bso", sequence_output, dense_w, precision=hi) + dense_b
    h = 0.5 * h * (1.0 + jax.lax.erf(h / jnp.sqrt(2.0).astype(h.dtype)))
    mean = jnp.mean(h, axis=-1, keepdims=True)
    var = jnp.mean((h - mean) ** 2, axis=-1, keepdims=True)
    h = (h - mean) * jax.lax.rsqrt(var + eps) * ln_gamma + ln_beta
    return jnp.einsum("bsh,vh->bsv", h, decoder_w, precision=hi) + decoder_b


if __name__ == "__main__":
    # Small shapes: batch=2, seq=7 (ragged on purpose), hidden=128, vocab=384.
    B, S, H, V = 2, 7, 128, 384
    key = jax.random.PRNGKey(0)
    k1, k2, k3, k4, k5 = jax.random.split(key, 5)

    sequence_output = jax.random.normal(k1, (B, S, H), dtype=jnp.float32)

    # Parameters in PyTorch layout: nn.Linear weight is (out, in).
    dense_w = jax.random.normal(k2, (H, H), dtype=jnp.float32) * 0.02
    dense_b = jax.random.normal(k3, (H,), dtype=jnp.float32) * 0.02
    ln_gamma = jnp.ones((H,), dtype=jnp.float32)
    ln_beta = jnp.zeros((H,), dtype=jnp.float32)
    decoder_w = jax.random.normal(k4, (V, H), dtype=jnp.float32) * 0.02
    decoder_b = jax.random.normal(k5, (V,), dtype=jnp.float32) * 0.02

    # One-time parameter prep (transpose + vocab padding), NOT per forward call.
    params = prepare_mlm_head_params(dense_w, dense_b, ln_gamma, ln_beta,
                                     decoder_w, decoder_b, vocab_tile=128)

    # f32 parity with the PyTorch head -> HIGHEST precision matmuls.
    out = yoso_mlm_head(sequence_output, params, row_tile=256,
                        precision=jax.lax.Precision.HIGHEST)
    out = jax.block_until_ready(out)

    ref = _reference(sequence_output, dense_w, dense_b, ln_gamma, ln_beta,
                     decoder_w, decoder_b)

    assert out.shape == (B, S, V)
    assert jnp.allclose(out, ref, atol=2e-3, rtol=2e-3), "mismatch vs reference"

    print("KERNEL_OK")
</pallas_src>

<mosaic_0001>
module attributes {stable_mosaic.version = 11 : i64} {
  func.func @_mlm_head_kernel(%arg0: i32, %arg1: i32, %arg2: memref<16x128xf32, #tpu.memory_space<vmem>>, %arg3: memref<128x128xf32, #tpu.memory_space<vmem>>, %arg4: memref<1x128xf32, #tpu.memory_space<vmem>>, %arg5: memref<1x128xf32, #tpu.memory_space<vmem>>, %arg6: memref<1x128xf32, #tpu.memory_space<vmem>>, %arg7: memref<128x128xf32, #tpu.memory_space<vmem>>, %arg8: memref<1x128xf32, #tpu.memory_space<vmem>>, %arg9: memref<16x128xf32, #tpu.memory_space<vmem>>, %arg10: memref<16x128xf32, #tpu.memory_space<vmem>>) attributes {dimension_semantics = [#tpu.dimension_semantics<parallel>, #tpu.dimension_semantics<arbitrary>], iteration_bounds = array<i64: 1, 3>, scalar_prefetch = 0 : i64, scratch_operands = 1 : i64, tpu.core_type = #tpu.core_type<tc>, window_params = [{transform_indices = @transform_0, window_bounds = array<i64: 16, 128>}, {pipeline_mode = #tpu.pipeline_mode<synchronous>, transform_indices = @transform_1, window_bounds = array<i64: 128, 128>}, {pipeline_mode = #tpu.pipeline_mode<synchronous>, transform_indices = @transform_2, window_bounds = array<i64: 1, 128>}, {pipeline_mode = #tpu.pipeline_mode<synchronous>, transform_indices = @transform_3, window_bounds = array<i64: 1, 128>}, {pipeline_mode = #tpu.pipeline_mode<synchronous>, transform_indices = @transform_4, window_bounds = array<i64: 1, 128>}, {transform_indices = @transform_5, window_bounds = array<i64: 128, 128>}, {transform_indices = @transform_6, window_bounds = array<i64: 1, 128>}, {transform_indices = @transform_7, window_bounds = array<i64: 16, 128>}]} {
    %c0_i32 = arith.constant 0 : i32
    %0 = arith.cmpi eq, %arg1, %c0_i32 : i32
    %1 = arith.extui %0 : i1 to i32
    %c0_i32_0 = arith.constant 0 : i32
    %2 = arith.cmpi ne, %1, %c0_i32_0 : i32
    scf.if %2 {
      %c0_8 = arith.constant 0 : index
      %c0_9 = arith.constant 0 : index
      %10 = vector.load %arg2[%c0_8, %c0_9] : memref<16x128xf32, #tpu.memory_space<vmem>>, vector<16x128xf32>
      %c0_10 = arith.constant 0 : index
      %c0_11 = arith.constant 0 : index
      %11 = vector.load %arg3[%c0_10, %c0_11] : memref<128x128xf32, #tpu.memory_space<vmem>>, vector<128x128xf32>
      %cst_12 = arith.constant dense<0.000000e+00> : vector<16x128xf32>
      %12 = tpu.matmul %10, %11, %cst_12 {dimension_numbers = #tpu.dot_dimension_numbers<[1], [0], [0], [1], [0, 0, 1, 1], [], []>, precision = #tpu.contract_precision<fp32>} : vector<16x128xf32>, vector<128x128xf32>, vector<16x128xf32> -> vector<16x128xf32>
      %c0_13 = arith.constant 0 : index
      %c0_14 = arith.constant 0 : index
      %13 = vector.load %arg4[%c0_13, %c0_14] : memref<1x128xf32, #tpu.memory_space<vmem>>, vector<1x128xf32>
      %14 = vector.broadcast %13 : vector<1x128xf32> to vector<16x128xf32>
      %15 = arith.addf %12, %14 : vector<16x128xf32>
      %cst_15 = arith.constant 5.000000e-01 : f32
      %16 = vector.broadcast %cst_15 : f32 to vector<16x128xf32>
      %17 = arith.mulf %16, %15 : vector<16x128xf32>
      %cst_16 = arith.constant 0.707106769 : f32
      %18 = vector.broadcast %cst_16 : f32 to vector<16x128xf32>
      %19 = arith.mulf %15, %18 : vector<16x128xf32>
      %20 = math.erf %19 : vector<16x128xf32>
      %cst_17 = arith.constant 1.000000e+00 : f32
      %21 = vector.broadcast %cst_17 : f32 to vector<16x128xf32>
      %22 = arith.addf %21, %20 : vector<16x128xf32>
      %23 = arith.mulf %17, %22 : vector<16x128xf32>
      %cst_18 = arith.constant dense<0.000000e+00> : vector<16xf32>
      %24 = vector.multi_reduction <add>, %23, %cst_18 [1] : vector<16x128xf32> to vector<16xf32>
      %25 = vector.shape_cast %24 : vector<16xf32> to vector<16x1xf32>
      %cst_19 = arith.constant 1.280000e+02 : f32
      %26 = vector.broadcast %cst_19 : f32 to vector<16x1xf32>
      %27 = arith.divf %25, %26 : vector<16x1xf32>
      %28 = vector.broadcast %27 : vector<16x1xf32> to vector<16x128xf32>
      %29 = arith.subf %23, %28 : vector<16x128xf32>
      %30 = arith.mulf %29, %29 : vector<16x128xf32>
      %cst_20 = arith.constant dense<0.000000e+00> : vector<16xf32>
      %31 = vector.multi_reduction <add>, %30, %cst_20 [1] : vector<16x128xf32> to vector<16xf32>
      %32 = vector.shape_cast %31 : vector<16xf32> to vector<16x1xf32>
      %cst_21 = arith.constant 1.280000e+02 : f32
      %33 = vector.broadcast %cst_21 : f32 to vector<16x1xf32>
      %34 = arith.divf %32, %33 : vector<16x1xf32>
      %cst_22 = arith.constant 9.99999996E-13 : f32
      %35 = vector.broadcast %cst_22 : f32 to vector<16x1xf32>
      %36 = arith.addf %34, %35 : vector<16x1xf32>
      %37 = math.rsqrt %36 : vector<16x1xf32>
      %38 = vector.broadcast %37 : vector<16x1xf32> to vector<16x128xf32>
      %39 = arith.mulf %29, %38 : vector<16x128xf32>
      %c0_23 = arith.constant 0 : index
      %c0_24 = arith.constant 0 : index
      %40 = vector.load %arg5[%c0_23, %c0_24] : memref<1x128xf32, #tpu.memory_space<vmem>>, vector<1x128xf32>
      %41 = vector.broadcast %40 : vector<1x128xf32> to vector<16x128xf32>
      %42 = arith.mulf %39, %41 : vector<16x128xf32>
      %c0_25 = arith.constant 0 : index
      %c0_26 = arith.constant 0 : index
      %43 = vector.load %arg6[%c0_25, %c0_26] : memref<1x128xf32, #tpu.memory_space<vmem>>, vector<1x128xf32>
      %44 = vector.broadcast %43 : vector<1x128xf32> to vector<16x128xf32>
      %45 = arith.addf %42, %44 : vector<16x128xf32>
      %c0_27 = arith.constant 0 : index
      %c0_28 = arith.constant 0 : index
      %46 = vector.load %arg10[%c0_27, %c0_28] : memref<16x128xf32, #tpu.memory_space<vmem>>, vector<16x128xf32>
      tpu.vector_store %arg10[%c0_27, %c0_28], %45 {strides = array<i32>} : memref<16x128xf32, #tpu.memory_space<vmem>>, vector<16x128xf32>,
    } else {
    }
    %c0 = arith.constant 0 : index
    %c0_1 = arith.constant 0 : index
    %3 = vector.load %arg10[%c0, %c0_1] : memref<16x128xf32, #tpu.memory_space<vmem>>, vector<16x128xf32>
    %c0_2 = arith.constant 0 : index
    %c0_3 = arith.constant 0 : index
    %4 = vector.load %arg7[%c0_2, %c0_3] : memref<128x128xf32, #tpu.memory_space<vmem>>, vector<128x128xf32>
    %cst = arith.constant dense<0.000000e+00> : vector<16x128xf32>
    %5 = tpu.matmul %3, %4, %cst {dimension_numbers = #tpu.dot_dimension_numbers<[1], [0], [0], [1], [0, 0, 1, 1], [], []>, precision = #tpu.contract_precision<fp32>} : vector<16x128xf32>, vector<128x128xf32>, vector<16x128xf32> -> vector<16x128xf32>
    %c0_4 = arith.constant 0 : index
    %c0_5 = arith.constant 0 : index
    %6 = vector.load %arg8[%c0_4, %c0_5] : memref<1x128xf32, #tpu.memory_space<vmem>>, vector<1x128xf32>
    %7 = vector.broadcast %6 : vector<1x128xf32> to vector<16x128xf32>
    %8 = arith.addf %5, %7 : vector<16x128xf32>
    %c0_6 = arith.constant 0 : index
    %c0_7 = arith.constant 0 : index
    %9 = vector.load %arg9[%c0_6, %c0_7] : memref<16x128xf32, #tpu.memory_space<vmem>>, vector<16x128xf32>
    tpu.vector_store %arg9[%c0_6, %c0_7], %8 {strides = array<i32>} : memref<16x128xf32, #tpu.memory_space<vmem>>, vector<16x128xf32>,
    return
  }
  func.func @transform_0(%arg0: i32, %arg1: i32) -> (i32, i32) {
    %c0_i32 = arith.constant 0 : i32
    %c0_i32_0 = arith.constant 0 : i32
    return %arg0, %c0_i32 : i32, i32
  }
  func.func @transform_1(%arg0: i32, %arg1: i32) -> (i32, i32) {
    %c0_i32 = arith.constant 0 : i32
    %c0_i32_0 = arith.constant 0 : i32
    %c0_i32_1 = arith.constant 0 : i32
    return %c0_i32, %c0_i32_0 : i32, i32
  }
  func.func @transform_2(%arg0: i32, %arg1: i32) -> (i32, i32) {
    %c0_i32 = arith.constant 0 : i32
    %c0_i32_0 = arith.constant 0 : i32
    %c0_i32_1 = arith.constant 0 : i32
    return %c0_i32, %c0_i32_0 : i32, i32
  }
  func.func @transform_3(%arg0: i32, %arg1: i32) -> (i32, i32) {
    %c0_i32 = arith.constant 0 : i32
    %c0_i32_0 = arith.constant 0 : i32
    %c0_i32_1 = arith.constant 0 : i32
    return %c0_i32, %c0_i32_0 : i32, i32
  }
  func.func @transform_4(%arg0: i32, %arg1: i32) -> (i32, i32) {
    %c0_i32 = arith.constant 0 : i32
    %c0_i32_0 = arith.constant 0 : i32
    %c0_i32_1 = arith.constant 0 : i32
    return %c0_i32, %c0_i32_0 : i32, i32
  }
  func.func @transform_5(%arg0: i32, %arg1: i32) -> (i32, i32) {
    %c0_i32 = arith.constant 0 : i32
    %c0_i32_0 = arith.constant 0 : i32
    return %c0_i32, %arg1 : i32, i32
  }
  func.func @transform_6(%arg0: i32, %arg1: i32) -> (i32, i32) {
    %c0_i32 = arith.constant 0 : i32
    %c0_i32_0 = arith.constant 0 : i32
    return %c0_i32, %arg1 : i32, i32
  }
  func.func @transform_7(%arg0: i32, %arg1: i32) -> (i32, i32) {
    %c0_i32 = arith.constant 0 : i32
    return %arg0, %arg1 : i32, i32
  }
}

</mosaic_0001>

<bundles_post_ra>
// kernel: tpu_custom_call.1
= control target key start
LH: loop header
LB: loop body
LE: loop exit
PB: predicated region body
PF: predicated region fallthrough
CT: control target
= control target key end

     0   :  { %s2577_s0 = inlined_call_operand.hbm [shape: f32[16,128], index: 0, kind: input, shape index: {}]   ;;  %s2578_s1 = inlined_call_operand.hbm [shape: f32[128,128], index: 1, kind: input, shape index: {}]   ;;  %s2579_s2 = inlined_call_operand.vmem [shape: f32[1,128], index: 2, kind: input, shape index: {}]   ;;  %s2580_s3 = inlined_call_operand.vmem [shape: f32[1,128], index: 3, kind: input, shape index: {}]   ;;  %s2581_s4 = inlined_call_operand.hbm [shape: f32[1,128], index: 4, kind: input, shape index: {}]   ;;  %s2582_s5 = inlined_call_operand.hbm [shape: f32[128,384], index: 5, kind: input, shape index: {}]   ;;  %s2583_s6 = inlined_call_operand.vmem [shape: f32[1,384], index: 6, kind: input, shape index: {}]   ;;  %s2584_s7 = inlined_call_operand.hbm [shape: f32[16,384], index: 7, kind: output, shape index: {}]  }
   0x1   :  { %2589 = sst [smem:[#allocation18_spill]] %s2577_s0 }
   0x2   :  { %2590 = sst [smem:[#allocation19_spill]] %s2578_s1 }
   0x3   :  { %2591 = sst [smem:[#allocation20_spill]] %s2581_s4 }
   0x4   :  { %12 = vsyncpa [#allocation4], 0 }
   0x5   :  { %13 = vsyncpa [#allocation7], 0 }
   0x6   :  { %14 = vsyncpa [#allocation10], 0 }
   0x7   :  { %16 = vsyncpa [#allocation10 + $0x1], 0 }
   0x8   :  { %17 = vsyncpa [#allocation5], 0 }
   0x9   :  { %19 = vsyncpa [#allocation5 + $0x1], 0  ;;  %s1932_s24 = smov 0   ;;  %s1934_s25 = smov 0  }
   0xa   :  { %s1936_s26 = smov 0   ;;  %s1938_s27 = smov 0  }
   0xb   :  { %s1940_s28 = smov 0   ;;  %s1942_s29 = smov 0  }
   0xc LB: > { %s1470_s30 = sadd.s32 4294967295, %s1880_s29   ;;  %s1471_s8 = sadd.s32 4294967294, %s1880_s29   ;;  %s1880_s29 = sphi %s1942_s29, %s25_s29   ;;  %s1876_s28 = sphi %s1940_s28, %s2613_s28   ;;  %s1872_s27 = sphi %s1938_s27, %s2612_s27   ;;  %s1868_s26 = sphi %s1936_s26, %s2611_s26   ;;  %s1864_s25 = sphi %s1934_s25, %s2610_s25   ;;  %s1860_s24 = sphi %s1932_s24, %s2609_s24  }
   0xd   : > { %p167_p0 = scmp.ne.s32.totalorder %s1864_s25, %s1860_s24  ;;  %p1966_p1 = scmp.eq.s32.totalorder %s1470_s30, 0 }
   0xe   : > { %p1970_p2 = scmp.eq.s32.totalorder %s1470_s30, 2  ;;  %p225_p3 = scmp.eq.s32.totalorder %s1471_s8, 2 }
   0xf   : > { %p1976_p4 = por %p1966_p1, %p167_p0  ;;  %p1472_p5 = scmp.ge.s32.totalorder %s1880_s29, 1 }
  0x10   : > { %p1981_p6 = por %p225_p3, %p167_p0  ;;  %p232_p7 = scmp.lt.s32.totalorder %s1880_s29, 4 }
  0x11   : > { %s2598_s1 = sld [smem:[#allocation19_spill]]  ;;  %s1882_s17 = smov [#allocation6]  }
  0x12   : > { %s2595_s12 = scalar_select %p1981_p6, 1, 0 }
  0x13   : > { %p1986_p8 = pnand %p1472_p5, %p232_p7  ;;  %s262_s18 = sshll.u32 %s1882_s17, 4  ;;  %s263_s18 = int_to_ptr.vmem [resolvable:$true] %s262_s18 }
  0x14   : > { %2596 = sst [smem:[#allocation16_spill]] %s2595_s12  ;;  %s2585_s23 = smov 128  }
  0x15   : > { %p1572_p9 = pneg %p1986_p8  ;;  %s2600_s0 = sld [smem:[#allocation18_spill]] }
  0x16   : > { %s2586_s30 = smov 8   ;;  %s1885_s8 = smov [#allocation3]  }
  0x17   : > { %s260_s16 = sshll.u32 %s2598_s1, 4  ;;  %p1997_p10 = pnand %p1572_p9, %p1966_p1  ;;  %s261_s16 = int_to_ptr.hbm [resolvable:$true] %s260_s16 }
  0x18   : > { %s248_s14 = sshll.u32 %s1885_s8, 4  ;;  %s2601_s4 = sld [smem:[#allocation20_spill]]  ;;  %s249_s14 = int_to_ptr.vmem [resolvable:$true] %s248_s14 }
  0x19   : > { %1578 = dma.hbm_to_vmem [thread:$0]  (!%p1997_p10), %s261_s16, 2048, %s263_s18, [#allocation7], %s2585_s23, %s2585_s23, %s2586_s30  }
  0x1a   : > { %s1886_s16 = smov [#allocation8]   ;;  %s34_s21 = sadd.s32 1, %s1876_s28 }
  0x1b   : > { %s246_s22 = sshll.u32 %s2600_s0, 4  ;;  %s283_s18 = sshll.u32 %s1886_s16, 4  ;;  %s247_s22 = int_to_ptr.hbm [resolvable:$true] %s246_s22  ;;  %s284_s18 = int_to_ptr.vmem [resolvable:$true] %s283_s18 }
  0x1c   : > { %1575 = dma.hbm_to_vmem [thread:$0]  (!%p1997_p10), %s247_s22, 256, %s249_s14, [#allocation4], %s2585_s23, %s2585_s23, %s2586_s30  }
  0x1d   : > { %p35_p11 = scmp.ge.s32.totalorder %s34_s21, 3  ;;  %s154_s8 = sadd.s32 1, %s1868_s26 }
  0x1e   : > { %s281_s20 = sshll.u32 %s2601_s4, 4  ;;  %p161_p12 = scmp.ne.s32.totalorder %s1868_s26, %s1864_s25  ;;  %s282_s20 = int_to_ptr.hbm [resolvable:$true] %s281_s20 }
  0x1f   : > { %1581 = dma.hbm_to_vmem [thread:$0]  (!%p1997_p10), %s282_s20, 16, %s284_s18, [#allocation7]  }
  0x20   : > { %p162_p13 = scmp.eq.s32.totalorder %s1880_s29, 0  ;;  %s2615_s21 = smov (%p35_p11, %s34_s21), 0 }
  0x21   : > { %2602 = sst [smem:[#allocation17_spill]] %s2615_s21  ;;  %p2032_p3 = por %p1970_p2, %p161_p12 }
  0x22   : > { %p2026_p0 = por %p162_p13, %p161_p12  ;;  %s151_s19 = ssub.s32 %s1876_s28, %s2615_s21 }
  0x23   : > { %p1593_p5 = scmp.lt.s32.totalorder %s1880_s29, 3  ;;  %p152_p7 = scmp.eq.s32.totalorder %s151_s19, 0 }
  0x24   : > { %s294_s14 = sand.u32 1, %s1868_s26   ;;  %s1478_s16 = sshll.u32 %s1876_s28, 3 }
  0x25   : > { %s1477_s17 = sshll.u32 %s294_s14, 7  ;;  %s302_s30 = scalar_lea.hbm %s2582_s5, %s1478_s16 }
  0x26   : > { %s2041_s20 = scalar_select %p152_p7, %s1868_s26, %s154_s8  }
  0x27   : > { %s298_s0 = scalar_lea.vmem [#allocation9], %s1477_s17  ;;  %s303_s10 = sshll.u32 %s302_s30, 4  ;;  %s304_s10 = int_to_ptr.hbm [resolvable:$true] %s303_s10 }
  0x28   : > { %s305_s1 = sshll.u32 %s298_s0, 4  ;;  %p1583_p2 = pnand %p1593_p5, %p2026_p0  ;;  %s306_s1 = int_to_ptr.vmem [resolvable:$true] %s305_s1 }
  0x29   : > { %s295_s4 = scalar_lea.sflag [#allocation10], %s294_s14  ;;  %s1887_s21 = smov 384  }
  0x2a   : > { %s2605_s12 = smov 8   ;;  %s2606_s19 = smov 128  }
  0x2b   : > { %1585 = dma.hbm_to_vmem [thread:$0]  (!%p1583_p2), %s304_s10, 2048, %s306_s1, %s295_s4, %s1887_s21, %s2606_s19, %s2605_s12  }
  0x2c   : > { %323 = sbr.rel (%p1986_p8) target bundleno = 809 (0x329), region = 48 }
  0x31   : > { %1843 = dma.done.wait (%p1966_p1), [#allocation4], 256  }
  0x32   : > { %1845 = vsyncadd (%p1966_p1), [#allocation4], 4294967040 }
  0x33   : > { %1847 = dma.done.wait (%p1966_p1), [#allocation7], 2064  }
  0x34   : > { %1849 = vsyncadd (%p1966_p1), [#allocation7], 4294965232  ;;  %s2062_s0 = sand.u32 1, %s1864_s25  }
  0x35   : > { %s1483_s1 = sshll.u32 %s2062_s0, 7  ;;  %s341_s4 = scalar_lea.sflag [#allocation10], %s2062_s0 }
  0x36   : > { %s2066_s12 = scalar_lea.vmem [#allocation9], %s1483_s1 }
  0x37   : > { %1851 = dma.done.wait (%p1976_p4), %s341_s4, 2048  }
  0x38   : > { %1853 = vsyncadd (%p1976_p4), %s341_s4, 4294965248  ;;  %s1484_s9 = sshll.u32 %s2062_s0, 4  ;;  %p380_p1 = scmp.lt.s32.totalorder %s1872_s27, 2 }
  0x39   : > { %s2081_s8 = scalar_lea.vmem [#allocation11], %s1484_s9  ;;  %p1485_p8 = scmp.ne.s32.totalorder %s1872_s27, 0 }
  0x3a   : > { %s2075_s13 = scalar_select %p380_p1, %s1872_s27, 2 }
  0x3b   : > { %387 = sbr.rel (%p1485_p8) target bundleno = 596 (0x254), region = 68 }
  0x3c   : > { %s382_s21 = scalar_lea.vmem %s2583_s6, %s2075_s13 }
  0x40   : > { %v405_v0 = vld [vmem:[#allocation6 + $0x78] sm:$0xff]  ;;  %v404_v1 = vld [vmem:[#allocation6 + $0x70] sm:$0xff]  ;;  %v403_v2 = vld [vmem:[#allocation6 + $0x68] sm:$0xff] }
  0x41   : > { %v2084_v3 = vand.u32 4294901760, %v405_v0  ;;  %v2086_v4 = vand.u32 4294901760, %v404_v1  ;;  %v2088_v5 = vand.u32 4294901760, %v403_v2  ;;  %v402_v6 = vld [vmem:[#allocation6 + $0x60] sm:$0xff]  ;;  %v401_v7 = vld [vmem:[#allocation6 + $0x58] sm:$0xff]  ;;  %v400_v8 = vld [vmem:[#allocation6 + $0x50] sm:$0xff] }
  0x42   : > { %v2090_v9 = vand.u32 4294901760, %v402_v6  ;;  %v2092_v10 = vand.u32 4294901760, %v401_v7  ;;  %v2094_v11 = vand.u32 4294901760, %v400_v8  ;;  %v399_v12 = vld [vmem:[#allocation6 + $0x48] sm:$0xff]  ;;  %v398_v13 = vld [vmem:[#allocation6 + $0x40] sm:$0xff]  ;;  %v397_v18 = vld [vmem:[#allocation6 + $0x38] sm:$0xff] }
  0x43   : > { %411 = vmatpush.msra.mxu0 %v2084_v3  ;;  %v460_v14 = vsub.f32 %v405_v0, %v2084_v3  ;;  %v466_v15 = vsub.f32 %v404_v1, %v2086_v4  ;;  %624 = vmatpush.msra.mxu3 %v2084_v3  ;;  %v472_v16 = vsub.f32 %v403_v2, %v2088_v5  ;;  %v2101_v17 = vand.u32 4294901760, %v399_v12  ;;  %v396_v26 = vld [vmem:[#allocation6 + $0x30] sm:$0xff]  ;;  %v395_v36 = vld [vmem:[#allocation6 + $0x28] sm:$0xff]  ;;  %v394_v42 = vld [vmem:[#allocation6 + $0x20] sm:$0xff] }
  0x44   : > { %v478_v19 = vsub.f32 %v402_v6, %v2090_v9  ;;  %v484_v20 = vsub.f32 %v401_v7, %v2092_v10  ;;  %v2105_v21 = vand.u32 4294901760, %v398_v13  ;;  %v490_v25 = vsub.f32 %v400_v8, %v2094_v11  ;;  %v393_v48 = vld [vmem:[#allocation6 + $0x18] sm:$0xff]  ;;  %v392_v54 = vld [vmem:[#allocation6 + $0x10] sm:$0xff]  ;;  %v391_v60 = vld [vmem:[#allocation6 + $0x8] sm:$0xff] }
  0x45   : > { %413 = vmatpush.msra.mxu0 %v2086_v4  ;;  %566 = vmatpush.msra.mxu2 %v460_v14  ;;  %v2108_v22 = vand.u32 4294901760, %v460_v14  ;;  %v2110_v23 = vand.u32 4294901760, %v466_v15  ;;  %v2112_v24 = vand.u32 4294901760, %v472_v16  ;;  %v496_v28 = vsub.f32 %v399_v12, %v2101_v17  ;;  %v390_v2 = vld [vmem:[#allocation6] sm:$0xff] }
  0x46   : > { %626 = vmatpush.msra.mxu3 %v2086_v4  ;;  %v2116_v27 = vand.u32 4294901760, %v478_v19  ;;  %v2119_v29 = vand.u32 4294901760, %v397_v18  ;;  %v2125_v33 = vand.u32 4294901760, %v484_v20  ;;  %v502_v34 = vsub.f32 %v398_v13, %v2105_v21 }
  0x47   : > { %415 = vmatpush.msra.mxu0 %v2088_v5  ;;  %569 = vmatpush.msra.mxu2 %v466_v15  ;;  %v462_v30 = vsub.f32 %v460_v14, %v2108_v22  ;;  %v468_v31 = vsub.f32 %v466_v15, %v2110_v23  ;;  %v474_v32 = vsub.f32 %v472_v16, %v2112_v24  ;;  %v2129_v35 = vand.u32 4294901760, %v396_v26 }
  0x48   : > { %628 = vmatpush.msra.mxu3 %v2088_v5  ;;  %v480_v39 = vsub.f32 %v478_v19, %v2116_v27  ;;  %v2133_v40 = vand.u32 4294901760, %v490_v25  ;;  %v2136_v41 = vand.u32 4294901760, %v496_v28  ;;  %v486_v44 = vsub.f32 %v484_v20, %v2125_v33 }
  0x49   : > { %417 = vmatpush.msra.mxu0 %v2090_v9  ;;  %572 = vmatpush.msra.mxu2 %v472_v16  ;;  %v463_v37 = vand.u32 4294901760, %v462_v30  ;;  %v469_v38 = vand.u32 4294901760, %v468_v31  ;;  %v475_v43 = vand.u32 4294901760, %v474_v32  ;;  %v508_v45 = vsub.f32 %v397_v18, %v2119_v29 }
  0x4a   : > { %630 = vmatpush.msra.mxu3 %v2090_v9  ;;  %v2141_v46 = vand.u32 4294901760, %v395_v36  ;;  %v2144_v47 = vand.u32 4294901760, %v502_v34  ;;  %v481_v49 = vand.u32 4294901760, %v480_v39  ;;  %v492_v50 = vsub.f32 %v490_v25, %v2133_v40 }
  0x4b   : > { %419 = vmatpush.msra.mxu0 %v2092_v10  ;;  %464 = vmatpush.msra.mxu1 %v463_v37  ;;  %v514_v51 = vsub.f32 %v396_v26, %v2129_v35  ;;  %v2149_v52 = vand.u32 4294901760, %v394_v42  ;;  %v498_v53 = vsub.f32 %v496_v28, %v2136_v41  ;;  %v487_v55 = vand.u32 4294901760, %v486_v44 }
  0x4c   : > { %575 = vmatpush.msra.mxu2 %v478_v19  ;;  %632 = vmatpush.msra.mxu3 %v2092_v10  ;;  %v520_v56 = vsub.f32 %v395_v36, %v2141_v46  ;;  %v2155_v57 = vand.u32 4294901760, %v393_v48  ;;  %v2157_v58 = vand.u32 4294901760, %v508_v45  ;;  %v504_v59 = vsub.f32 %v502_v34, %v2144_v47 }
  0x4d   : > { %421 = vmatpush.msra.mxu0 %v2094_v11  ;;  %470 = vmatpush.msra.mxu1 %v469_v38  ;;  %v493_v61 = vand.u32 4294901760, %v492_v50  ;;  %v526_v62 = vsub.f32 %v394_v42, %v2149_v52  ;;  %v2163_v63 = vand.u32 4294901760, %v392_v54  ;;  %v2165_v0 = vand.u32 4294901760, %v514_v51  ;;  %v388_v38 = vld [vmem:[#allocation3] sm:$0xff] }
  0x4e   : > { %578 = vmatpush.msra.mxu2 %v484_v20  ;;  %634 = vmatpush.msra.mxu3 %v2094_v11  ;;  %v499_v1 = vand.u32 4294901760, %v498_v53  ;;  %v510_v6 = vsub.f32 %v508_v45, %v2157_v58  ;;  %v532_v7 = vsub.f32 %v393_v48, %v2155_v57  ;;  %v2171_v8 = vand.u32 4294901760, %v391_v60 }
  0x4f   : > { %423 = vmatpush.msra.mxu0 %v2101_v17  ;;  %476 = vmatpush.msra.mxu1 %v475_v43  ;;  %v2173_v12 = vand.u32 4294901760, %v520_v56  ;;  %v505_v13 = vand.u32 4294901760, %v504_v59  ;;  %v516_v14 = vsub.f32 %v514_v51, %v2165_v0  ;;  %v538_v15 = vsub.f32 %v392_v54, %v2163_v63  ;;  %v389_v54 = vld [vmem:[#allocation3 + $0x8] sm:$0xff] }
  0x50   : > { %581 = vmatpush.msra.mxu2 %v490_v25  ;;  %636 = vmatpush.msra.mxu3 %v2101_v17  ;;  %v2179_v16 = vand.u32 4294901760, %v390_v2  ;;  %v2181_v18 = vand.u32 4294901760, %v526_v62  ;;  %v511_v19 = vand.u32 4294901760, %v510_v6  ;;  %v544_v25 = vsub.f32 %v391_v60, %v2171_v8 }
  0x51   : > { %425 = vmatpush.msra.mxu0 %v2105_v21  ;;  %482 = vmatpush.msra.mxu1 %v481_v49  ;;  %v522_v20 = vsub.f32 %v520_v56, %v2173_v12  ;;  %v2187_v26 = vand.u32 4294901760, %v532_v7  ;;  %v2193_v32 = vand.u32 4294901760, %v538_v15  ;;  %v2206_v44 = vand.u32 4294901760, %v388_v38 }
  0x52   : > { %584 = vmatpush.msra.mxu2 %v496_v28  ;;  %638 = vmatpush.msra.mxu3 %v2105_v21  ;;  %v517_v28 = vand.u32 4294901760, %v516_v14  ;;  %v528_v30 = vsub.f32 %v526_v62, %v2181_v18  ;;  %v550_v31 = vsub.f32 %v390_v2, %v2179_v16  ;;  %v2198_v37 = vand.u32 4294901760, %v544_v25 }
  0x53   : > { %427 = vmatpush.msra.mxu0 %v2119_v29  ;;  %488 = vmatpush.msra.mxu1 %v487_v55  ;;  %v534_v36 = vsub.f32 %v532_v7, %v2187_v26  ;;  %v540_v42 = vsub.f32 %v538_v15, %v2193_v32  ;;  %v2221_v59 = vand.u32 4294901760, %v389_v54 }
  0x54   : > { %587 = vmatpush.msra.mxu2 %v502_v34  ;;  %640 = vmatpush.msra.mxu3 %v2119_v29  ;;  %v523_v34 = vand.u32 4294901760, %v522_v20  ;;  %v529_v39 = vand.u32 4294901760, %v528_v30  ;;  %v2203_v43 = vand.u32 4294901760, %v550_v31  ;;  %v546_v48 = vsub.f32 %v544_v25, %v2198_v37 }
  0x55   : > { %429 = vmatpush.msra.mxu0 %v2129_v35  ;;  %494 = vmatpush.msra.mxu1 %v493_v61  ;;  %v541_v49 = vand.u32 4294901760, %v540_v42 }
  0x56   : > { %590 = vmatpush.msra.mxu2 %v508_v45  ;;  %642 = vmatpush.msra.mxu3 %v2129_v35  ;;  %v535_v45 = vand.u32 4294901760, %v534_v36  ;;  %v552_v50 = vsub.f32 %v550_v31, %v2203_v43  ;;  %v547_v53 = vand.u32 4294901760, %v546_v48 }
  0x57   : > { %431 = vmatpush.msra.mxu0 %v2141_v46  ;;  %500 = vmatpush.msra.mxu1 %v499_v1 }
  0x58   : > { %593 = vmatpush.msra.mxu2 %v514_v51  ;;  %644 = vmatpush.msra.mxu3 %v2141_v46  ;;  %v443_v51 = vsub.f32 %v388_v38, %v2206_v44  ;;  %v553_v55 = vand.u32 4294901760, %v552_v50 }
  0x59   : > { %433 = vmatpush.msra.mxu0 %v2149_v52  ;;  %506 = vmatpush.msra.mxu1 %v505_v13 }
  0x5a   : > { %596 = vmatpush.msra.mxu2 %v520_v56  ;;  %646 = vmatpush.msra.mxu3 %v2149_v52  ;;  %v444_v56 = vand.u32 4294901760, %v443_v51 }
  0x5b   : > { %435 = vmatpush.msra.mxu0 %v2155_v57  ;;  %512 = vmatpush.msra.mxu1 %v511_v19 }
  0x5c   : > { %599 = vmatpush.msra.mxu2 %v526_v62  ;;  %648 = vmatpush.msra.mxu3 %v2155_v57 }
  0x5d   : > { %437 = vmatpush.msra.mxu0 %v2163_v63  ;;  %518 = vmatpush.msra.mxu1 %v517_v28 }
  0x5e   : > { %602 = vmatpush.msra.mxu2 %v532_v7  ;;  %650 = vmatpush.msra.mxu3 %v2163_v63 }
  0x5f   : > { %439 = vmatpush.msra.mxu0 %v2171_v8  ;;  %524 = vmatpush.msra.mxu1 %v523_v34 }
  0x60   : > { %605 = vmatpush.msra.mxu2 %v538_v15  ;;  %652 = vmatpush.msra.mxu3 %v2171_v8 }
  0x61   : > { %441 = vmatpush.msra.mxu0 %v2179_v16  ;;  %530 = vmatpush.msra.mxu1 %v529_v39 }
  0x62   : > { %608 = vmatpush.msra.mxu2 %v544_v25  ;;  %654 = vmatpush.msra.mxu3 %v2179_v16 }
  0x63   : > { %671 = vmatpush.msrb.mxu0 %v2108_v22  ;;  %536 = vmatpush.msra.mxu1 %v535_v45 }
  0x64   : > { %611 = vmatpush.msra.mxu2 %v550_v31  ;;  %1508 = vmatpush.msrb.mxu3 %v2084_v3 }
  0x65   : > { %675 = vmatpush.msrb.mxu0 %v2110_v23  ;;  %542 = vmatpush.msra.mxu1 %v541_v49 }
  0x66   : > { %1492 = vmatpush.msrb.mxu2 %v2108_v22  ;;  %1509 = vmatpush.msrb.mxu3 %v2086_v4  ;;  %v445_v22 = vsub.f32 %v443_v51, %v444_v56 }
  0x67   : > { %679 = vmatpush.msrb.mxu0 %v2112_v24  ;;  %548 = vmatpush.msra.mxu1 %v547_v53 }
  0x68   : > { %1493 = vmatpush.msrb.mxu2 %v2110_v23  ;;  %1510 = vmatpush.msrb.mxu3 %v2088_v5  ;;  %v451_v23 = vsub.f32 %v389_v54, %v2221_v59 }
  0x69   : > { %683 = vmatpush.msrb.mxu0 %v2116_v27  ;;  %554 = vmatpush.msra.mxu1 %v553_v55 }
  0x6a   : > { %1494 = vmatpush.msrb.mxu2 %v2112_v24  ;;  %1511 = vmatpush.msrb.mxu3 %v2090_v9  ;;  %v452_v24 = vand.u32 4294901760, %v451_v23 }
  0x6b   : > { %687 = vmatpush.msrb.mxu0 %v2125_v33  ;;  %742 = vmatpush.msrb.mxu1 %v2084_v3  ;;  %v446_v3 = vand.u32 4294901760, %v445_v22 }
  0x6c   : > { %1495 = vmatpush.msrb.mxu2 %v2116_v27  ;;  %1512 = vmatpush.msrb.mxu3 %v2092_v10 }
  0x6d   : > { %691 = vmatpush.msrb.mxu0 %v2133_v40  ;;  %744 = vmatpush.msrb.mxu1 %v2086_v4  ;;  %v453_v4 = vsub.f32 %v451_v23, %v452_v24 }
  0x6e   : > { %1496 = vmatpush.msrb.mxu2 %v2125_v33  ;;  %1513 = vmatpush.msrb.mxu3 %v2094_v11 }
  0x6f   : > { %695 = vmatpush.msrb.mxu0 %v2136_v41  ;;  %746 = vmatpush.msrb.mxu1 %v2088_v5  ;;  %v454_v5 = vand.u32 4294901760, %v453_v4 }
  0x70   : > { %1497 = vmatpush.msrb.mxu2 %v2133_v40  ;;  %447 = vmatmul.f32.vlgmr.msra.gmra.mxu0 %v446_v3 }
  0x71   : > { %699 = vmatpush.msrb.mxu0 %v2144_v47  ;;  %748 = vmatpush.msrb.mxu1 %v2090_v9 }
  0x72   : > { %1498 = vmatpush.msrb.mxu2 %v2136_v41  ;;  %1514 = vmatpush.msrb.mxu3 %v2101_v17 }
  0x73   : > { %750 = vmatpush.msrb.mxu1 %v2092_v10  ;;  %703 = vmatpush.msrb.mxu0 %v2157_v58 }
  0x74   : > { %1499 = vmatpush.msrb.mxu2 %v2144_v47  ;;  %1515 = vmatpush.msrb.mxu3 %v2105_v21 }
  0x75   : > { %614 = vmatmul.f32.vlgmr.msra.gmra.mxu2 %v443_v51  ;;  %707 = vmatpush.msrb.mxu0 %v2165_v0 }
  0x76   : > { %1500 = vmatpush.msrb.mxu2 %v2157_v58  ;;  %752 = vmatpush.msrb.mxu1 %v2094_v11  ;;  %v1656_v11 = vld [vmem:[%s2579_s2] ss:$0 sm:$0xff] }
  0x77   : > { %658 = vmatmul.f32.vlgmr.msra.gmra.mxu3 %v444_v56  ;;  %711 = vmatpush.msrb.mxu0 %v2173_v12 }
  0x78   : > { %1501 = vmatpush.msrb.mxu2 %v2165_v0  ;;  %754 = vmatpush.msrb.mxu1 %v2101_v17 }
  0x79   : > { %1516 = vmatpush.msrb.mxu3 %v2119_v29  ;;  %715 = vmatpush.msrb.mxu0 %v2181_v18 }
  0x7a   : > { %1502 = vmatpush.msrb.mxu2 %v2173_v12  ;;  %756 = vmatpush.msrb.mxu1 %v2105_v21 }
  0x7b   : > { %1517 = vmatpush.msrb.mxu3 %v2129_v35  ;;  %455 = vmatmul.f32.gmra.mxu0 %v454_v5 }
  0x7c   : > { %556 = vmatmul.f32.vlgmr.msra.gmra.mxu1 %v2206_v44  ;;  %1503 = vmatpush.msrb.mxu2 %v2181_v18 }
  0x7d   : > { %719 = vmatpush.msrb.mxu0 %v2187_v26  ;;  %758 = vmatpush.msrb.mxu1 %v2119_v29 }
  0x7e   : > { %1518 = vmatpush.msrb.mxu3 %v2141_v46  ;;  %619 = vmatmul.f32.gmra.mxu2 %v451_v23 }
  0x7f   : > { %1504 = vmatpush.msrb.mxu2 %v2187_v26  ;;  %723 = vmatpush.msrb.mxu0 %v2193_v32 }
  0x80   : > { %760 = vmatpush.msrb.mxu1 %v2129_v35  ;;  %1519 = vmatpush.msrb.mxu3 %v2149_v52 }
  0x81   : > { %664 = vmatmul.f32.gmra.mxu3 %v452_v24  ;;  %1505 = vmatpush.msrb.mxu2 %v2193_v32 }
  0x82   : > { %727 = vmatpush.msrb.mxu0 %v2198_v37  ;;  %762 = vmatpush.msrb.mxu1 %v2141_v46 }
  0x83   : > { %1520 = vmatpush.msrb.mxu3 %v2155_v57  ;;  %1506 = vmatpush.msrb.mxu2 %v2198_v37 }
  0x84   : > { %731 = vmatpush.msrb.mxu0 %v2203_v43  ;;  %764 = vmatpush.msrb.mxu1 %v2149_v52 }
  0x85   : > { %1521 = vmatpush.msrb.mxu3 %v2163_v63  ;;  %560 = vmatmul.f32.gmra.mxu1 %v2221_v59 }
  0x86   : > { %733 = vmatmul.f32.vlgmr.msrb.gmra.mxu0 %v2206_v44  ;;  %1507 = vmatpush.msrb.mxu2 %v2203_v43 }
  0x87   : > { %766 = vmatpush.msrb.mxu1 %v2155_v57  ;;  %1522 = vmatpush.msrb.mxu3 %v2171_v8 }
  0x88   : > { %737 = vmatmul.f32.vlgmr.msrb.gmra.mxu2 %v2221_v59 }
  0x89   : > { %768 = vmatpush.msrb.mxu1 %v2163_v63  ;;  %1523 = vmatpush.msrb.mxu3 %v2179_v16 }
  0x8a   : > { %778 = vmatmul.f32.vlgmr.msrb.gmra.mxu3 %v2221_v59 }
  0x8b   : > { %770 = vmatpush.msrb.mxu1 %v2171_v8 }
  0x8d   : > { %772 = vmatpush.msrb.mxu1 %v2179_v16 }
  0x8e   : > { %774 = vmatmul.f32.vlgmr.msrb.gmra.mxu1 %v2206_v44 }
  0xed   : > { %v448_v9 = vpop.f32.mrf.mxu0 }
  0xee   : > { %v449_v27 = vadd.f32 %v1656_v11, %v448_v9 }
  0xf8   : > { %v615_v10 = vpop.f32.mrf.mxu2  ;;  %v456_v29 = vpop.f32.mrf.mxu0 }
  0xf9   : > { %v557_v17 = vpop.f32.mrf.mxu1  ;;  %v457_v33 = vadd.f32 %v1656_v11, %v456_v29 }
  0xfa   : > { %v659_v21 = vpop.f32.mrf.mxu3  ;;  %v558_v35 = vadd.f32 %v557_v17, %v449_v27 }
  0xfc   : > { %v616_v47 = vadd.f32 %v615_v10, %v558_v35 }
  0xfe   : > { %v660_v60 = vadd.f32 %v659_v21, %v616_v47 }
 0x101   : > { %v620_v40 = vpop.f32.mrf.mxu2 }
 0x102   : > { %v561_v41 = vpop.f32.mrf.mxu1 }
 0x103   : > { %v562_v46 = vadd.f32 %v561_v41, %v457_v33  ;;  %v734_v58 = vpop.f32.mrf.mxu0 }
 0x104   : > { %v665_v52 = vpop.f32.mrf.mxu3  ;;  %v735_v61 = vadd.f32 %v734_v58, %v660_v60 }
 0x105   : > { %v621_v57 = vadd.f32 %v620_v40, %v562_v46 }
 0x107   : > { %v666_v62 = vadd.f32 %v665_v52, %v621_v57 }
 0x10b   : > { %v738_v63 = vpop.f32.mrf.mxu2  ;;  %v775_v0 = vpop.f32.mrf.mxu1 }
 0x10c   : > { %v739_v1 = vadd.f32 %v738_v63, %v666_v62  ;;  %v2291_v2 = vadd.f32 %v775_v0, %v735_v61 }
 0x10d   : > { %v779_v6 = vpop.f32.mrf.mxu3 }
 0x10e   : > { %v2294_v7 = vmul.f32 0.70710677, %v2291_v2  ;;  %v2296_v8 = vadd.f32 %v779_v6, %v739_v1 }
 0x110   : > { %v786_v12 = vmul.f32 %v2294_v7, %v2294_v7  ;;  %v2301_v13 = vmul.f32 0.70710677, %v2296_v8 }
 0x112   : > { %v787_v14 = vmin.f32 %v786_v12, 16.0  ;;  %v826_v15 = vmul.f32 %v2301_v13, %v2301_v13 }
 0x114   : > { %v788_v16 = vmul.f32 2.1237322e-06, %v787_v14  ;;  %v827_v18 = vmin.f32 %v826_v15, 16.0  ;;  %v799_v19 = vmul.f32 3.8918573e-05, %v787_v14 }
 0x116   : > { %v789_v20 = vadd.f32 0.00028619796, %v788_v16  ;;  %v828_v25 = vmul.f32 2.1237322e-06, %v827_v18  ;;  %v800_v26 = vadd.f32 0.001143296, %v799_v19 }
 0x117   : > { %v839_v28 = vmul.f32 3.8918573e-05, %v827_v18 }
 0x118   : > { %v790_v30 = vmul.f32 %v789_v20, %v787_v14  ;;  %v829_v31 = vadd.f32 0.00028619796, %v828_v25  ;;  %v801_v32 = vmul.f32 %v800_v26, %v787_v14 }
 0x119   : > { %v840_v34 = vadd.f32 0.001143296, %v839_v28  ;;  %v782_v28 = vmul.f32 0.5, %v2291_v2 }
 0x11a   : > { %v830_v36 = vmul.f32 %v829_v31, %v827_v18  ;;  %v802_v37 = vadd.f32 0.014752088, %v801_v32  ;;  %v791_v38 = vadd.f32 0.0036580483, %v790_v30 }
 0x11b   : > { %v841_v39 = vmul.f32 %v840_v34, %v827_v18  ;;  %v783_v34 = vmul.f32 0.5, %v2296_v8 }
 0x11c   : > { %v803_v42 = vmul.f32 %v802_v37, %v787_v14  ;;  %v831_v43 = vadd.f32 0.0036580483, %v830_v36  ;;  %v792_v48 = vmul.f32 %v791_v38, %v787_v14  ;;  %v1888_v37 = vmov 128.0  }
 0x11d   : > { %v842_v44 = vadd.f32 0.014752088, %v841_v39 }
 0x11e   : > { %v804_v45 = vadd.f32 0.112945676, %v803_v42  ;;  %v832_v51 = vmul.f32 %v831_v43, %v827_v18  ;;  %v793_v55 = vadd.f32 0.05243302, %v792_v48 }
 0x11f   : > { %v843_v49 = vmul.f32 %v842_v44, %v827_v18 }
 0x120   : > { %v805_v50 = vmul.f32 %v804_v45, %v787_v14  ;;  %v833_v22 = vadd.f32 0.05243302, %v832_v51  ;;  %v794_v24 = vmul.f32 %v793_v55, %v787_v14 }
 0x121   : > { %v844_v53 = vadd.f32 0.112945676, %v843_v49 }
 0x122   : > { %v806_v54 = vadd.f32 0.4994258, %v805_v50  ;;  %v834_v5 = vmul.f32 %v833_v22, %v827_v18  ;;  %v795_v10 = vadd.f32 0.18741608, %v794_v24 }
 0x123   : > { %v845_v56 = vmul.f32 %v844_v53, %v827_v18 }
 0x124   : > { %v807_v59 = vmul.f32 %v806_v54, %v787_v14  ;;  %v835_v11 = vadd.f32 0.18741608, %v834_v5  ;;  %v796_v21 = vmul.f32 %v795_v10, %v787_v14 }
 0x125   : > { %v846_v23 = vadd.f32 0.4994258, %v845_v56 }
 0x126   : > { %v808_v3 = vadd.f32 1.0, %v807_v59  ;;  %v836_v33 = vmul.f32 %v835_v11, %v827_v18  ;;  %v797_v46 = vadd.f32 1.1283791, %v796_v21  ;;  %v1657_v21 = vld [vmem:[%s2580_s3] ss:$0 sm:$0xff] }
 0x127   : > { %v847_v4 = vmul.f32 %v846_v23, %v827_v18 }
 0x128   : > { %1659 = vrcp.f32 %v808_v3  ;;  %v820_v40 = vand.u32 2147483648, %v808_v3  ;;  %v818_v52 = vand.u32 2147483647, %v808_v3  ;;  %v837_v58 = vadd.f32 1.1283791, %v836_v33 }
 0x129   : > { %v848_v9 = vadd.f32 1.0, %v847_v4  ;;  %vm814_vm1 = vweird.f32 %v808_v3  ;;  %v798_v1 = vmul.f32 %v797_v46, %v2294_v7  ;;  %v1658_v33 = vld [vmem:[#allocation8] ss:$0 sm:$0xff] }
 0x12a   : > { %v821_v62 = vor.u32 1.1754944e-38, %v820_v40  ;;  %vm819_vm4 = vcmp.eq.f32.partialorder %v818_v52, 8.507059e+37  ;;  %v838_v18 = vmul.f32 %v837_v58, %v2301_v13 }
 0x12b   : > { %1661 = vrcp.f32 %v848_v9  ;;  %v860_v61 = vand.u32 2147483648, %v848_v9  ;;  %v858_v0 = vand.u32 2147483647, %v848_v9  ;;  %vm854_vm5 = vweird.f32 %v848_v9 }
 0x12c   : > { %1663 = vrcp.f32 %v1888_v37 }
 0x12d   : > { %v861_v16 = vor.u32 1.1754944e-38, %v860_v61  ;;  %vm859_vm7 = vcmp.eq.f32.partialorder %v858_v0, 8.507059e+37 }
 0x12e   : > { %v1660_v17 = vpop.eup %1659 }
 0x12f   : > { %v810_v27 = vmul.f32 %v1660_v17, %v808_v3  ;;  %vm815_vm0 = vweird.f32 %v1660_v17 }
 0x130   : > { %vm816_vm2 = vmor %vm814_vm1, %vm815_vm0 }
 0x131   : > { %v1662_v29 = vpop.eup %1661  ;;  %v811_v35 = vsub.f32 1.0, %v810_v27 }
 0x132   : > { %v850_v41 = vmul.f32 %v1662_v29, %v848_v9  ;;  %vm855_vm3 = vweird.f32 %v1662_v29  ;;  %v1664_v38 = vpop.eup %1663 }
 0x133   : > { %v812_v47 = vmul.f32 %v1660_v17, %v811_v35  ;;  %vm856_vm6 = vmor %vm854_vm5, %vm855_vm3  ;;  %v875_v13 = vmul.f32 128.0, %v1664_v38  ;;  %vm879_vm8 = vweird.f32 %v1664_v38 }
 0x134   : > { %v851_v57 = vsub.f32 1.0, %v850_v41 }
 0x135   : > { %v813_v60 = vadd.f32 %v1660_v17, %v812_v47  ;;  %v876_v39 = vsub.f32 1.0, %v875_v13 }
 0x136   : > { %v852_v63 = vmul.f32 %v1662_v29, %v851_v57 }
 0x137   : > { %v817_v6 = vsel %vm816_vm2, %v1660_v17, %v813_v60  ;;  %v877_v42 = vmul.f32 %v1664_v38, %v876_v39 }
 0x138   : > { %v822_v12 = vsel %vm819_vm4, %v821_v62, %v817_v6  ;;  %v853_v14 = vadd.f32 %v1662_v29, %v852_v63 }
 0x139   : > { %v823_v15 = vmul.f32 %v822_v12, %v798_v1  ;;  %v878_v43 = vadd.f32 %v1664_v38, %v877_v42 }
 0x13a   : > { %v857_v19 = vsel %vm856_vm6, %v1662_v29, %v853_v14 }
 0x13b   : > { %v1486_v20 = vclamps-f32 %v823_v15, 1.0  ;;  %v862_v25 = vsel %vm859_vm7, %v861_v16, %v857_v19  ;;  %v880_v44 = vsel %vm879_vm8, %v1664_v38, %v878_v43 }
 0x13c   : > { %v863_v26 = vmul.f32 %v862_v25, %v838_v18 }
 0x13d   : > { %v866_v30 = vadd.f32 1.0, %v1486_v20 }
 0x13e   : > { %v1487_v7 = vclamps-f32 %v863_v26, 1.0 }
 0x13f   : > { %v868_v31 = vmul.f32 %v866_v30, %v782_v28 }
 0x140   : > { %v867_v32 = vadd.f32 1.0, %v1487_v7 }
 0x141   : > { %870 = vadd.xlane.f32.xlu0 %v868_v31 }
 0x142   : > { %v869_v36 = vmul.f32 %v867_v32, %v783_v34 }
 0x149   : > { %872 = vadd.xlane.f32.xlu0 %v869_v36 }
 0x1b4   : > { %v871_v45 = vpop.xlane.xlu0 %870 }
 0x1b5   : > { %v881_v2 = vmul.f32 %v880_v44, %v871_v45 }
 0x1b7   : > { %v883_v48 = vsub.f32 %v868_v31, %v881_v2 }
 0x1b9   : > { %v885_v49 = vmul.f32 %v883_v48, %v883_v48 }
 0x1bb   : > { %887 = vadd.xlane.f32.xlu1 %v885_v49 }
 0x1bc   : > { %v873_v50 = vpop.xlane.xlu0 %872 }
 0x1bd   : > { %v882_v51 = vmul.f32 %v880_v44, %v873_v50 }
 0x1bf   : > { %v884_v53 = vsub.f32 %v869_v36, %v882_v51 }
 0x1c1   : > { %v886_v8 = vmul.f32 %v884_v53, %v884_v53 }
 0x1c3   : > { %889 = vadd.xlane.f32.xlu1 %v886_v8 }
 0x22e   : > { %v888_v54 = vpop.xlane.xlu1 %887 }
 0x22f   : > { %v891_v55 = vmul.f32 %v888_v54, %v880_v44 }
 0x231   : > { %v893_v56 = vadd.f32 1e-12, %v891_v55 }
 0x233   : > { %1665 = vrsqrt.f32 %v893_v56  ;;  %vm901_vm10 = vweird.f32 %v893_v56 }
 0x236   : > { %v890_v59 = vpop.xlane.xlu1 %889 }
 0x237   : > { %v892_v22 = vmul.f32 %v890_v59, %v880_v44 }
 0x239   : > { %v1666_v23 = vpop.eup %1665  ;;  %v894_v3 = vadd.f32 1e-12, %v892_v22 }
 0x23a   : > { %v896_v24 = vmul.f32 %v1666_v23, %v893_v56  ;;  %vm902_vm9 = vweird.f32 %v1666_v23 }
 0x23b   : > { %1667 = vrsqrt.f32 %v894_v3  ;;  %vm903_vm11 = vmor %vm901_vm10, %vm902_vm9  ;;  %vm911_vm13 = vweird.f32 %v894_v3 }
 0x23c   : > { %v897_v4 = vmul.f32 %v1666_v23, %v896_v24 }
 0x23e   : > { %v898_v5 = vmul.f32 0.5, %v897_v4 }
 0x240   : > { %v899_v9 = vsub.f32 1.5, %v898_v5 }
 0x241   : > { %v1668_v10 = vpop.eup %1667 }
 0x242   : > { %v900_v11 = vmul.f32 %v1666_v23, %v899_v9  ;;  %v906_v17 = vmul.f32 %v1668_v10, %v894_v3  ;;  %vm912_vm12 = vweird.f32 %v1668_v10 }
 0x243   : > { %vm913_vm14 = vmor %vm911_vm13, %vm912_vm12 }
 0x244   : > { %v904_v27 = vsel %vm903_vm11, %v1666_v23, %v900_v11  ;;  %v907_v29 = vmul.f32 %v1668_v10, %v906_v17 }
 0x245   : > { %v915_v35 = vmul.f32 %v904_v27, %v883_v48 }
 0x246   : > { %v908_v40 = vmul.f32 0.5, %v907_v29 }
 0x247   : > { %v921_v41 = vmul.f32 %v1657_v21, %v915_v35 }
 0x248   : > { %v909_v46 = vsub.f32 1.5, %v908_v40 }
 0x249   : > { %v927_v47 = vadd.f32 %v1658_v33, %v921_v41 }
 0x24a   : > { %v910_v52 = vmul.f32 %v1668_v10, %v909_v46 }
 0x24b   : > { %929 = vst [vmem:[#allocation2] sm:$0xff] %v927_v47 }
 0x24c   : > { %v914_v57 = vsel %vm913_vm14, %v1668_v10, %v910_v52 }
 0x24d   : > { %v916_v58 = vmul.f32 %v914_v57, %v884_v53 }
 0x24f   : > { %v922_v60 = vmul.f32 %v1657_v21, %v916_v58 }
 0x251   : > { %v928_v61 = vadd.f32 %v1658_v33, %v922_v60 }
 0x253   : > { %930 = vst [vmem:[#allocation2 + $0x8] sm:$0xff] %v928_v61 }
 0x254 PF: > { %v948_v62 = vld [vmem:[%s2066_s12 + $0x78] sm:$0xff]  ;;  %v947_v63 = vld [vmem:[%s2066_s12 + $0x70] sm:$0xff]  ;;  %v946_v0 = vld [vmem:[%s2066_s12 + $0x68] sm:$0xff]  ;;  %s1489_s10 = sshll.u32 %s1872_s27, 3  ;;  %s1328_s27 = scalar_lea.sflag [#allocation5], %s2062_s0 }
 0x255   : > { %v2315_v1 = vand.u32 4294901760, %v948_v62  ;;  %v2317_v6 = vand.u32 4294901760, %v947_v63  ;;  %v2319_v12 = vand.u32 4294901760, %v946_v0  ;;  %v945_v14 = vld [vmem:[%s2066_s12 + $0x60] sm:$0xff]  ;;  %v944_v15 = vld [vmem:[%s2066_s12 + $0x58] sm:$0xff]  ;;  %v943_v16 = vld [vmem:[%s2066_s12 + $0x50] sm:$0xff]  ;;  %s1341_s4 = scalar_lea.hbm %s2584_s7, %s1489_s10 }
 0x256   : > { %v2324_v18 = vand.u32 4294901760, %v945_v14  ;;  %v2326_v19 = vand.u32 4294901760, %v944_v15  ;;  %v2328_v20 = vand.u32 4294901760, %v943_v16  ;;  %v942_v25 = vld [vmem:[%s2066_s12 + $0x48] sm:$0xff]  ;;  %v941_v26 = vld [vmem:[%s2066_s12 + $0x40] sm:$0xff]  ;;  %v940_v32 = vld [vmem:[%s2066_s12 + $0x38] sm:$0xff] }
 0x257   : > { %954 = vmatpush.msra.mxu0 %v2315_v1  ;;  %v1003_v28 = vsub.f32 %v948_v62, %v2315_v1  ;;  %v1009_v30 = vsub.f32 %v947_v63, %v2317_v6  ;;  %1167 = vmatpush.msra.mxu3 %v2315_v1  ;;  %v1015_v31 = vsub.f32 %v946_v0, %v2319_v12  ;;  %v2337_v7 = vand.u32 4294901760, %v942_v25  ;;  %v939_v43 = vld [vmem:[%s2066_s12 + $0x30] sm:$0xff]  ;;  %v938_v54 = vld [vmem:[%s2066_s12 + $0x28] sm:$0xff]  ;;  %v937_v3 = vld [vmem:[%s2066_s12 + $0x20] sm:$0xff]  ;;  %s1344_s9 = sshll.u32 %s1341_s4, 4  ;;  %s1810_s11 = scalar_lea.hbm %s2584_s7, 48  ;;  %s1345_s9 = int_to_ptr.hbm [resolvable:$true] %s1344_s9 }
 0x258   : > { %v1021_v34 = vsub.f32 %v945_v14, %v2324_v18  ;;  %v1027_v36 = vsub.f32 %v944_v15, %v2326_v19  ;;  %v2342_v37 = vand.u32 4294901760, %v941_v26  ;;  %v1033_v42 = vsub.f32 %v943_v16, %v2328_v20  ;;  %v936_v11 = vld [vmem:[%s2066_s12 + $0x18] sm:$0xff]  ;;  %v935_v35 = vld [vmem:[%s2066_s12 + $0x10] sm:$0xff]  ;;  %v934_v57 = vld [vmem:[%s2066_s12 + $0x8] sm:$0xff]  ;;  %s1804_s13 = sshra.s32 %s1345_s9, 4  ;;  %s1805_s13 = int_to_ptr.hbm [resolvable:$true] %s1804_s13 }
 0x259   : > { %956 = vmatpush.msra.mxu0 %v2317_v6  ;;  %1109 = vmatpush.msra.mxu2 %v1003_v28  ;;  %v2345_v38 = vand.u32 4294901760, %v1003_v28  ;;  %v2347_v13 = vand.u32 4294901760, %v1009_v30  ;;  %v2349_v39 = vand.u32 4294901760, %v1015_v31  ;;  %v1039_v45 = vsub.f32 %v942_v25, %v2337_v7  ;;  %v933_v0 = vld [vmem:[%s2066_s12] sm:$0xff]  ;;  %s1342_s12 = sshll.u32 %s2081_s8, 4  ;;  %s1806_s23 = scalar_lea.hbm %s1805_s13, 16  ;;  %s1343_s12 = int_to_ptr.vmem [resolvable:$true] %s1342_s12 }
 0x25a   : > { %1169 = vmatpush.msra.mxu3 %v2317_v6  ;;  %v2354_v44 = vand.u32 4294901760, %v1021_v34  ;;  %v2357_v2 = vand.u32 4294901760, %v940_v32  ;;  %v2363_v51 = vand.u32 4294901760, %v1027_v36  ;;  %v1045_v53 = vsub.f32 %v941_v26, %v2342_v37  ;;  %p1807_p4 = scmp.ne.s32.totalorder %s1805_s13, %s1806_s23  ;;  %p1811_p11 = scmp.lt.s32.totalorder %s1805_s13, %s2584_s7 }
 0x25b   : > { %958 = vmatpush.msra.mxu0 %v2319_v12  ;;  %1112 = vmatpush.msra.mxu2 %v1009_v30  ;;  %v1005_v48 = vsub.f32 %v1003_v28, %v2345_v38  ;;  %v1011_v49 = vsub.f32 %v1009_v30, %v2347_v13  ;;  %v1017_v50 = vsub.f32 %v1015_v31, %v2349_v39  ;;  %v2367_v8 = vand.u32 4294901760, %v939_v43  ;;  %p1812_p12 = scmp.lt.s32.totalorder %s1810_s11, %s1806_s23 }
 0x25c   : > { %1171 = vmatpush.msra.mxu3 %v2319_v12  ;;  %v1023_v59 = vsub.f32 %v1021_v34, %v2354_v44  ;;  %v2372_v22 = vand.u32 4294901760, %v1033_v42  ;;  %v2375_v23 = vand.u32 4294901760, %v1039_v45  ;;  %v1029_v4 = vsub.f32 %v1027_v36, %v2363_v51  ;;  %p1808_p9 = pnand %p1807_p4, %p2032_p3 }
 0x25d   : > { %960 = vmatpush.msra.mxu0 %v2324_v18  ;;  %1115 = vmatpush.msra.mxu2 %v1015_v31  ;;  %v1006_v55 = vand.u32 4294901760, %v1005_v48  ;;  %v1012_v56 = vand.u32 4294901760, %v1011_v49  ;;  %v1018_v24 = vand.u32 4294901760, %v1017_v50  ;;  %v1051_v5 = vsub.f32 %v940_v32, %v2357_v2  ;;  %p1813_p13 = por %p1812_p12, %p1811_p11 }
 0x25e   : > { %1173 = vmatpush.msra.mxu3 %v2324_v18  ;;  %v2381_v9 = vand.u32 4294901760, %v938_v54  ;;  %v2384_v10 = vand.u32 4294901760, %v1045_v53  ;;  %v1024_v17 = vand.u32 4294901760, %v1023_v59  ;;  %v1035_v21 = vsub.f32 %v1033_v42, %v2372_v22  ;;  %p1809_p10 = pneg %p1808_p9 }
 0x25f   : > { %962 = vmatpush.msra.mxu0 %v2326_v19  ;;  %1007 = vmatpush.msra.mxu1 %v1006_v55  ;;  %v1057_v27 = vsub.f32 %v939_v43, %v2367_v8  ;;  %v2390_v29 = vand.u32 4294901760, %v937_v3  ;;  %v1041_v33 = vsub.f32 %v1039_v45, %v2375_v23  ;;  %v1030_v40 = vand.u32 4294901760, %v1029_v4 }
 0x260   : > { %1118 = vmatpush.msra.mxu2 %v1021_v34  ;;  %1175 = vmatpush.msra.mxu3 %v2326_v19  ;;  %v1063_v41 = vsub.f32 %v938_v54, %v2381_v9  ;;  %v2397_v46 = vand.u32 4294901760, %v936_v11  ;;  %v2399_v47 = vand.u32 4294901760, %v1051_v5  ;;  %v1047_v52 = vsub.f32 %v1045_v53, %v2384_v10  ;;  %p1814_p0 = pnand %p1813_p13, %p1809_p10 }
 0x261   : > { %964 = vmatpush.msra.mxu0 %v2328_v20  ;;  %1013 = vmatpush.msra.mxu1 %v1012_v56  ;;  %v1036_v58 = vand.u32 4294901760, %v1035_v21  ;;  %v1069_v60 = vsub.f32 %v937_v3, %v2390_v29  ;;  %v2406_v61 = vand.u32 4294901760, %v935_v35  ;;  %v2408_v62 = vand.u32 4294901760, %v1057_v27  ;;  %v931_v56 = vld [vmem:[#allocation2] sm:$0xff] }
 0x262   : > { %1121 = vmatpush.msra.mxu2 %v1027_v36  ;;  %1177 = vmatpush.msra.mxu3 %v2328_v20  ;;  %v1042_v63 = vand.u32 4294901760, %v1041_v33  ;;  %v1053_v14 = vsub.f32 %v1051_v5, %v2399_v47  ;;  %v1075_v15 = vsub.f32 %v936_v11, %v2397_v46  ;;  %v2415_v16 = vand.u32 4294901760, %v934_v57 }
 0x263   : > { %966 = vmatpush.msra.mxu0 %v2337_v7  ;;  %1019 = vmatpush.msra.mxu1 %v1018_v24  ;;  %v2417_v25 = vand.u32 4294901760, %v1063_v41  ;;  %v1048_v26 = vand.u32 4294901760, %v1047_v52  ;;  %v1059_v28 = vsub.f32 %v1057_v27, %v2408_v62  ;;  %v1081_v30 = vsub.f32 %v935_v35, %v2406_v61 }
 0x264   : > { %1124 = vmatpush.msra.mxu2 %v1033_v42  ;;  %1179 = vmatpush.msra.mxu3 %v2337_v7  ;;  %v2423_v31 = vand.u32 4294901760, %v933_v0  ;;  %v2425_v32 = vand.u32 4294901760, %v1069_v60  ;;  %v1054_v34 = vand.u32 4294901760, %v1053_v14  ;;  %v1087_v42 = vsub.f32 %v934_v57, %v2415_v16 }
 0x265   : > { %968 = vmatpush.msra.mxu0 %v2342_v37  ;;  %1025 = vmatpush.msra.mxu1 %v1024_v17  ;;  %v1065_v36 = vsub.f32 %v1063_v41, %v2417_v25  ;;  %v2431_v43 = vand.u32 4294901760, %v1075_v15  ;;  %v2437_v50 = vand.u32 4294901760, %v1081_v30  ;;  %v2450_v4 = vand.u32 4294901760, %v931_v56 }
 0x266   : > { %1127 = vmatpush.msra.mxu2 %v1039_v45  ;;  %1181 = vmatpush.msra.mxu3 %v2342_v37  ;;  %v1060_v45 = vand.u32 4294901760, %v1059_v28  ;;  %v1071_v48 = vsub.f32 %v1069_v60, %v2425_v32  ;;  %v1093_v49 = vsub.f32 %v933_v0, %v2423_v31  ;;  %v2442_v55 = vand.u32 4294901760, %v1087_v42 }
 0x267   : > { %970 = vmatpush.msra.mxu0 %v2357_v2  ;;  %1031 = vmatpush.msra.mxu1 %v1030_v40  ;;  %v1077_v54 = vsub.f32 %v1075_v15, %v2431_v43  ;;  %v1083_v3 = vsub.f32 %v1081_v30, %v2437_v50  ;;  %v932_v40 = vld [vmem:[#allocation2 + $0x8] sm:$0xff] }
 0x268   : > { %1130 = vmatpush.msra.mxu2 %v1045_v53  ;;  %1183 = vmatpush.msra.mxu3 %v2357_v2  ;;  %v1066_v53 = vand.u32 4294901760, %v1065_v36  ;;  %v1072_v59 = vand.u32 4294901760, %v1071_v48  ;;  %v2447_v24 = vand.u32 4294901760, %v1093_v49  ;;  %v1089_v11 = vsub.f32 %v1087_v42, %v2442_v55 }
 0x269   : > { %972 = vmatpush.msra.mxu0 %v2367_v8  ;;  %1037 = vmatpush.msra.mxu1 %v1036_v58  ;;  %v1084_v17 = vand.u32 4294901760, %v1083_v3  ;;  %v2467_v52 = vand.u32 4294901760, %v932_v40 }
 0x26a   : > { %1133 = vmatpush.msra.mxu2 %v1051_v5  ;;  %1185 = vmatpush.msra.mxu3 %v2367_v8  ;;  %v1078_v5 = vand.u32 4294901760, %v1077_v54  ;;  %v1095_v21 = vsub.f32 %v1093_v49, %v2447_v24  ;;  %v1090_v33 = vand.u32 4294901760, %v1089_v11 }
 0x26b   : > { %974 = vmatpush.msra.mxu0 %v2381_v9  ;;  %1043 = vmatpush.msra.mxu1 %v1042_v63 }
 0x26c   : > { %1136 = vmatpush.msra.mxu2 %v1057_v27  ;;  %1187 = vmatpush.msra.mxu3 %v2381_v9  ;;  %v986_v27 = vsub.f32 %v931_v56, %v2450_v4  ;;  %v1096_v35 = vand.u32 4294901760, %v1095_v21 }
 0x26d   : > { %976 = vmatpush.msra.mxu0 %v2390_v29  ;;  %1049 = vmatpush.msra.mxu1 %v1048_v26 }
 0x26e   : > { %1139 = vmatpush.msra.mxu2 %v1063_v41  ;;  %1189 = vmatpush.msra.mxu3 %v2390_v29  ;;  %v987_v41 = vand.u32 4294901760, %v986_v27 }
 0x26f   : > { %978 = vmatpush.msra.mxu0 %v2397_v46  ;;  %1055 = vmatpush.msra.mxu1 %v1054_v34 }
 0x270   : > { %1142 = vmatpush.msra.mxu2 %v1069_v60  ;;  %1191 = vmatpush.msra.mxu3 %v2397_v46 }
 0x271   : > { %980 = vmatpush.msra.mxu0 %v2406_v61  ;;  %1061 = vmatpush.msra.mxu1 %v1060_v45 }
 0x272   : > { %1145 = vmatpush.msra.mxu2 %v1075_v15  ;;  %1193 = vmatpush.msra.mxu3 %v2406_v61 }
 0x273   : > { %982 = vmatpush.msra.mxu0 %v2415_v16  ;;  %1067 = vmatpush.msra.mxu1 %v1066_v53 }
 0x274   : > { %1148 = vmatpush.msra.mxu2 %v1081_v30  ;;  %1195 = vmatpush.msra.mxu3 %v2415_v16 }
 0x275   : > { %984 = vmatpush.msra.mxu0 %v2423_v31  ;;  %1073 = vmatpush.msra.mxu1 %v1072_v59 }
 0x276   : > { %1151 = vmatpush.msra.mxu2 %v1087_v42  ;;  %1197 = vmatpush.msra.mxu3 %v2423_v31 }
 0x277   : > { %1214 = vmatpush.msrb.mxu0 %v2345_v38  ;;  %1079 = vmatpush.msra.mxu1 %v1078_v5 }
 0x278   : > { %1154 = vmatpush.msra.mxu2 %v1093_v49  ;;  %1540 = vmatpush.msrb.mxu3 %v2315_v1 }
 0x279   : > { %1218 = vmatpush.msrb.mxu0 %v2347_v13  ;;  %1085 = vmatpush.msra.mxu1 %v1084_v17 }
 0x27a   : > { %1524 = vmatpush.msrb.mxu2 %v2345_v38  ;;  %1541 = vmatpush.msrb.mxu3 %v2317_v6  ;;  %v988_v38 = vsub.f32 %v986_v27, %v987_v41 }
 0x27b   : > { %1222 = vmatpush.msrb.mxu0 %v2349_v39  ;;  %1091 = vmatpush.msra.mxu1 %v1090_v33 }
 0x27c   : > { %1525 = vmatpush.msrb.mxu2 %v2347_v13  ;;  %1542 = vmatpush.msrb.mxu3 %v2319_v12  ;;  %v994_v13 = vsub.f32 %v932_v40, %v2467_v52 }
 0x27d   : > { %1226 = vmatpush.msrb.mxu0 %v2354_v44  ;;  %1097 = vmatpush.msra.mxu1 %v1096_v35 }
 0x27e   : > { %1526 = vmatpush.msrb.mxu2 %v2349_v39  ;;  %1543 = vmatpush.msrb.mxu3 %v2324_v18 }
 0x27f   : > { %1230 = vmatpush.msrb.mxu0 %v2363_v51  ;;  %1285 = vmatpush.msrb.mxu1 %v2315_v1  ;;  %v989_v1 = vand.u32 4294901760, %v988_v38 }
 0x280   : > { %1527 = vmatpush.msrb.mxu2 %v2354_v44  ;;  %1544 = vmatpush.msrb.mxu3 %v2326_v19 }
 0x281   : > { %1234 = vmatpush.msrb.mxu0 %v2372_v22  ;;  %1287 = vmatpush.msrb.mxu1 %v2317_v6  ;;  %v995_v6 = vand.u32 4294901760, %v994_v13 }
 0x282   : > { %1528 = vmatpush.msrb.mxu2 %v2363_v51  ;;  %1545 = vmatpush.msrb.mxu3 %v2328_v20 }
 0x283   : > { %1238 = vmatpush.msrb.mxu0 %v2375_v23  ;;  %1289 = vmatpush.msrb.mxu1 %v2319_v12  ;;  %v996_v12 = vsub.f32 %v994_v13, %v995_v6 }
 0x284   : > { %1529 = vmatpush.msrb.mxu2 %v2372_v22  ;;  %990 = vmatmul.f32.vlgmr.msra.gmra.mxu0 %v989_v1 }
 0x285   : > { %1242 = vmatpush.msrb.mxu0 %v2384_v10  ;;  %1291 = vmatpush.msrb.mxu1 %v2324_v18  ;;  %v997_v18 = vand.u32 4294901760, %v996_v12 }
 0x286   : > { %1530 = vmatpush.msrb.mxu2 %v2375_v23  ;;  %1546 = vmatpush.msrb.mxu3 %v2337_v7 }
 0x287   : > { %1293 = vmatpush.msrb.mxu1 %v2326_v19  ;;  %1246 = vmatpush.msrb.mxu0 %v2399_v47 }
 0x288   : > { %1531 = vmatpush.msrb.mxu2 %v2384_v10  ;;  %1547 = vmatpush.msrb.mxu3 %v2342_v37 }
 0x289   : > { %1157 = vmatmul.f32.vlgmr.msra.gmra.mxu2 %v986_v27  ;;  %1250 = vmatpush.msrb.mxu0 %v2408_v62 }
 0x28a   : > { %1532 = vmatpush.msrb.mxu2 %v2399_v47  ;;  %1295 = vmatpush.msrb.mxu1 %v2328_v20 }
 0x28b   : > { %1201 = vmatmul.f32.vlgmr.msra.gmra.mxu3 %v987_v41  ;;  %1254 = vmatpush.msrb.mxu0 %v2417_v25 }
 0x28c   : > { %1533 = vmatpush.msrb.mxu2 %v2408_v62  ;;  %1297 = vmatpush.msrb.mxu1 %v2337_v7 }
 0x28d   : > { %1548 = vmatpush.msrb.mxu3 %v2357_v2  ;;  %1099 = vmatmul.f32.vlgmr.msra.gmra.mxu1 %v2450_v4 }
 0x28e   : > { %1534 = vmatpush.msrb.mxu2 %v2417_v25  ;;  %1258 = vmatpush.msrb.mxu0 %v2425_v32 }
 0x28f   : > { %1299 = vmatpush.msrb.mxu1 %v2342_v37  ;;  %1549 = vmatpush.msrb.mxu3 %v2367_v8  ;;  %v1669_v37 = vld [vmem:[%s382_s21] ss:$0 sm:$0xff] }
 0x290   : > { %998 = vmatmul.f32.gmra.mxu0 %v997_v18  ;;  %1535 = vmatpush.msrb.mxu2 %v2425_v32 }
 0x291   : > { %1262 = vmatpush.msrb.mxu0 %v2431_v43  ;;  %1301 = vmatpush.msrb.mxu1 %v2357_v2 }
 0x292   : > { %1550 = vmatpush.msrb.mxu3 %v2381_v9  ;;  %1162 = vmatmul.f32.gmra.mxu2 %v994_v13 }
 0x293   : > { %1536 = vmatpush.msrb.mxu2 %v2431_v43  ;;  %1266 = vmatpush.msrb.mxu0 %v2437_v50 }
 0x294   : > { %1303 = vmatpush.msrb.mxu1 %v2367_v8  ;;  %1551 = vmatpush.msrb.mxu3 %v2390_v29 }
 0x295   : > { %1207 = vmatmul.f32.gmra.mxu3 %v995_v6  ;;  %1537 = vmatpush.msrb.mxu2 %v2437_v50 }
 0x296   : > { %1270 = vmatpush.msrb.mxu0 %v2442_v55  ;;  %1305 = vmatpush.msrb.mxu1 %v2381_v9 }
 0x297   : > { %1552 = vmatpush.msrb.mxu3 %v2397_v46  ;;  %1103 = vmatmul.f32.gmra.mxu1 %v2467_v52 }
 0x298   : > { %1538 = vmatpush.msrb.mxu2 %v2442_v55  ;;  %1274 = vmatpush.msrb.mxu0 %v2447_v24 }
 0x299   : > { %1307 = vmatpush.msrb.mxu1 %v2390_v29  ;;  %1553 = vmatpush.msrb.mxu3 %v2406_v61 }
 0x29a   : > { %1276 = vmatmul.f32.vlgmr.msrb.gmra.mxu0 %v2450_v4  ;;  %1539 = vmatpush.msrb.mxu2 %v2447_v24 }
 0x29b   : > { %1309 = vmatpush.msrb.mxu1 %v2397_v46  ;;  %1554 = vmatpush.msrb.mxu3 %v2415_v16 }
 0x29c   : > { %1280 = vmatmul.f32.vlgmr.msrb.gmra.mxu2 %v2467_v52 }
 0x29d   : > { %1311 = vmatpush.msrb.mxu1 %v2406_v61  ;;  %1555 = vmatpush.msrb.mxu3 %v2423_v31 }
 0x29e   : > { %1321 = vmatmul.f32.vlgmr.msrb.gmra.mxu3 %v2467_v52 }
 0x29f   : > { %1313 = vmatpush.msrb.mxu1 %v2415_v16 }
 0x2a1   : > { %1315 = vmatpush.msrb.mxu1 %v2423_v31 }
 0x2a2   : > { %1317 = vmatmul.f32.vlgmr.msrb.gmra.mxu1 %v2450_v4 }
 0x301   : > { %v991_v19 = vpop.f32.mrf.mxu0 }
 0x302   : > { %v992_v44 = vadd.f32 %v1669_v37, %v991_v19 }
 0x30a   : > { %v1100_v20 = vpop.f32.mrf.mxu1 }
 0x30b   : > { %v1101_v8 = vadd.f32 %v1100_v20, %v992_v44 }
 0x30c   : > { %v1158_v7 = vpop.f32.mrf.mxu2 }
 0x30d   : > { %v999_v2 = vpop.f32.mrf.mxu0  ;;  %v1159_v10 = vadd.f32 %v1158_v7, %v1101_v8 }
 0x30e   : > { %v1202_v39 = vpop.f32.mrf.mxu3  ;;  %v1000_v51 = vadd.f32 %v1669_v37, %v999_v2 }
 0x30f   : > { %v1203_v57 = vadd.f32 %v1202_v39, %v1159_v10 }
 0x314   : > { %v1104_v22 = vpop.f32.mrf.mxu1 }
 0x315   : > { %v1163_v23 = vpop.f32.mrf.mxu2  ;;  %v1105_v9 = vadd.f32 %v1104_v22, %v1000_v51 }
 0x317   : > { %v1164_v46 = vadd.f32 %v1163_v23, %v1105_v9  ;;  %v1277_v47 = vpop.f32.mrf.mxu0 }
 0x318   : > { %v1208_v29 = vpop.f32.mrf.mxu3  ;;  %v1278_v58 = vadd.f32 %v1277_v47, %v1203_v57 }
 0x319   : > { %v1209_v60 = vadd.f32 %v1208_v29, %v1164_v46 }
 0x31f   : > { %v1281_v61 = vpop.f32.mrf.mxu2  ;;  %v1318_v62 = vpop.f32.mrf.mxu1 }
 0x320   : > { %v1282_v63 = vadd.f32 %v1281_v61, %v1209_v60  ;;  %v1319_v0 = vadd.f32 %v1318_v62, %v1278_v58 }
 0x321   : > { %v1322_v14 = vpop.f32.mrf.mxu3 }
 0x322   : > { %1325 = vst [vmem:[%s2081_s8] sm:$0xff] %v1319_v0  ;;  %v1323_v15 = vadd.f32 %v1322_v14, %v1282_v63 }
 0x324   : > { %1326 = vst [vmem:[%s2081_s8 + $0x8] sm:$0xff] %v1323_v15 }
 0x325   : > { %1817 = shalt.err (!%p1814_p0)
}
 0x326   : > { %s1889_s0 = smov 128   ;;  %s1890_s8 = smov 384  }
 0x327   : > { %s1891_s17 = smov 8  }
 0x328   : > { %1570 = dma.vmem_to_hbm [thread:$0]  (%p2032_p3), %s1343_s12, 256, %s1345_s9, %s1328_s27, %s1889_s0, %s1890_s8, %s1891_s17  }
 0x329 PF: > { %p1597_p5 = scmp.ge.s32.totalorder %s1880_s29, 2  ;;  %s1359_s18 = sand.u32 1, %s1860_s24  }
 0x32a   : > { %s1360_s10 = scalar_lea.sflag [#allocation5], %s1359_s18 }
 0x32b   : > { %p1587_p7 = pnand %p1597_p5, %p1981_p6 }
 0x32d   : > { %p1588_p2 = pneg %p1587_p7 }
 0x32f   : > { %1855 = dma.done.wait (%p1588_p2), %s1360_s10, 256  }
 0x330   : > { %1857 = vsyncadd (%p1588_p2), %s1360_s10, 4294967040  ;;  %s25_s29 = sadd.s32 1, %s1880_s29   ;;  %s2608_s22 = sld [smem:[#allocation17_spill]] }
 0x331   : > { %p22_p1 = scmp.ge.s32.totalorder %s25_s29, 5   ;;  %s2609_s24 = smov %s1864_s25 }
 0x332   : > { %s2610_s25 = smov %s1868_s26  ;;  %s2611_s26 = smov %s2041_s20 }
 0x333   : > { %s2612_s27 = smov %s1876_s28  ;;  %24 = sbr.rel (!%p22_p1) target bundleno = 12 (0xc), region = 114 }
 0x336   : > { %s2613_s28 = smov %s2608_s22 }
 0x338   :  { %1366 = vsyncpa [#allocation4], 1 }
 0x339   :  { %1368 = vsyncpa [#allocation4 + $0x1], 1 }
 0x33a   :  { %1369 = vsyncpa [#allocation7], 1 }
 0x33b   :  { %1370 = vsyncpa [#allocation10], 1 }
 0x33c   :  { %1372 = vsyncpa [#allocation10 + $0x1], 1 }
 0x33d   :  { %1373 = vsyncpa [#allocation5], 1 }
 0x33e   :  { %1375 = vsyncpa [#allocation5 + $0x1], 1 }

</bundles_post_ra>
